<compile_context>
chip_gen: v5e
topology: v5e:2x2
jax: 0.10.0
libtpu: 0.0.40
codegen_flags: <defaults>
</compile_context>

<pallas_src>
import jax
import jax.numpy as jnp
from jax.experimental import pallas as pl
from jax.experimental.pallas import tpu as pltpu

BN_EPS = 1e-5
LANE = 128


def _round_up(x, m):
    return (x + m - 1) // m * m


def _pick_row_tile(hp):
    """Largest row-strip height <= 32 that divides hp and yields >= 2 strips."""
    for tr in range(min(hp, 32), 0, -1):
        if hp % tr == 0 and (hp // tr) >= 2:
            return tr
    return hp


def _vmem_limit_bytes():
    try:
        cap = int(pltpu.get_tpu_info().vmem_capacity_bytes)
        return int(max(min(cap * 7 // 8, 112 * 1024 * 1024), 32 * 1024 * 1024))
    except Exception:
        return 64 * 1024 * 1024


# --------------------------------------------------------------------------
# Shared conv kernel: 3x3 conv (padding already in the halo'd input strip)
# as 9 accumulating MXU matmuls + per-strip BN moments.  Used for both convs.
# --------------------------------------------------------------------------
def _conv_moments_kernel(xs_ref, w_ref, y_ref, s_ref):
    # xs_ref: (1, TR+2, Wp+2, Ci)  bf16  input strip incl. 1-px zero halo
    # w_ref : (9, Ci, Co)          bf16  3x3 taps, tap index = dy*3 + dx
    # y_ref : (1, TR, Wp, Co)      bf16  raw conv output (pre-BN)
    # s_ref : (1, 1, 2, Co)        f32   per-strip [sum, sum_of_squares]
    _, trh, wph, ci = xs_ref.shape
    tr, wp = trh - 2, wph - 2
    co = y_ref.shape[-1]

    acc = None                                            # f32 accumulator
    for dy in range(3):
        for dx in range(3):
            tap = xs_ref[0, dy:dy + tr, dx:dx + wp, :].reshape(tr * wp, ci)
            part = jnp.dot(tap, w_ref[dy * 3 + dx],
                           preferred_element_type=jnp.float32)
            acc = part if acc is None else acc + part

    yb = acc.astype(jnp.bfloat16)                         # bf16 intermediate
    y_ref[0] = yb.reshape(tr, wp, co)

    # BN moments of the (bf16-rounded) conv output, accumulated in f32.
    ybf = yb.astype(jnp.float32)
    s_ref[0, 0] = jnp.concatenate(
        [jnp.sum(ybf, axis=0, keepdims=True),
         jnp.sum(ybf * ybf, axis=0, keepdims=True)], axis=0)


# --------------------------------------------------------------------------
# wrapper
# --------------------------------------------------------------------------
def down_forward(x_nchw, params):
    """down = MaxPool2d(2) -> (Conv3x3 -> BN -> ReLU) x2 (training-mode BN).

    x_nchw: (N, Cin, H, W) float32.  Returns (N, Cout, H//2, W//2) float32.
    Conv weights are given in HWIO layout (torch weight.permute(2, 3, 1, 0)).
    """
    w1, g1, b1, w2, g2, b2 = params
    N, Cin, H, W = x_nchw.shape
    Cout = w1.shape[-1]
    Hp, Wp = H // 2, W // 2
    Cip, Cop = _round_up(Cin, LANE), _round_up(Cout, LANE)

    TR = _pick_row_tile(Hp)
    RT = Hp // TR
    # Row indices (into a spatially 1-px padded image) of each halo'd strip.
    strip_rows = jnp.asarray(
        [r * TR + i for r in range(RT) for i in range(TR + 2)], dtype=jnp.int32)

    # ---- fused XLA pre-pass: NCHW->NHWC, MaxPool2d(2), bf16 cast, channel
    #      lane-pad, spatial zero-pad, halo'd row-strip layout. ----
    x = jnp.transpose(x_nchw, (0, 2, 3, 1))
    x = jnp.max(x.reshape(N, Hp, 2, Wp, 2, Cin), axis=(2, 4))      # MaxPool2d(2)
    x = jnp.pad(x.astype(jnp.bfloat16),
                ((0, 0), (1, 1), (1, 1), (0, Cip - Cin)))
    x_strips = x[:, strip_rows]                   # (N, RT*(TR+2), Wp+2, Cip)

    # Fold the 3x3 taps into (9, Ci, Co) matmul operands (zero-padded lanes).
    w1p = jnp.pad(w1, ((0, 0), (0, 0), (0, Cip - Cin), (0, Cop - Cout))
                  ).reshape(9, Cip, Cop).astype(jnp.bfloat16)
    w2p = jnp.pad(w2, ((0, 0), (0, 0), (0, Cop - Cout), (0, Cop - Cout))
                  ).reshape(9, Cop, Cop).astype(jnp.bfloat16)
    g1p = jnp.pad(g1.astype(jnp.float32), (0, Cop - Cout))
    b1p = jnp.pad(b1.astype(jnp.float32), (0, Cop - Cout))
    g2p = jnp.pad(g2.astype(jnp.float32), (0, Cop - Cout))
    b2p = jnp.pad(b2.astype(jnp.float32), (0, Cop - Cout))

    cparams = pltpu.CompilerParams(
        dimension_semantics=("parallel", "parallel"),   # batch x row-strip
        vmem_limit_bytes=_vmem_limit_bytes())

    def conv_pass(strips, w9, ci):
        return pl.pallas_call(
            _conv_moments_kernel,
            grid=(N, RT),
            in_specs=[
                pl.BlockSpec((1, TR + 2, Wp + 2, ci), lambda n, r: (n, r, 0, 0)),
                # constant across the grid -> single-buffer to save VMEM
                pl.BlockSpec((9, ci, Cop), lambda n, r: (0, 0, 0),
                             pipeline_mode=pl.Buffered(1)),
            ],
            out_specs=(
                pl.BlockSpec((1, TR, Wp, Cop), lambda n, r: (n, r, 0, 0)),
                pl.BlockSpec((1, 1, 2, Cop), lambda n, r: (n, r, 0, 0)),
            ),
            out_shape=(
                jax.ShapeDtypeStruct((N, Hp, Wp, Cop), jnp.bfloat16),
                jax.ShapeDtypeStruct((N, RT, 2, Cop), jnp.float32),
            ),
            compiler_params=cparams,
        )(strips, w9)

    cnt = N * Hp * Wp

    def bn_affine(s, gamma_p, beta_p):
        tot = jnp.sum(s, axis=(0, 1))                     # (2, Cop) tiny
        mean = tot[0] / cnt
        var = jnp.maximum(tot[1] / cnt - mean * mean, 0.0)
        scale = gamma_p * jax.lax.rsqrt(var + BN_EPS)
        return scale, beta_p - mean * scale

    # ---- pass 1: conv1 + moments ----
    y1, s1 = conv_pass(x_strips, w1p, Cip)
    scale1, shift1 = bn_affine(s1, g1p, b1p)

    # ---- fused XLA mid-pass: BN1 + ReLU + spatial pad + halo'd strips ----
    a1 = jnp.maximum(y1.astype(jnp.float32) * scale1 + shift1, 0.0)
    a1 = jnp.pad(a1.astype(jnp.bfloat16), ((0, 0), (1, 1), (1, 1), (0, 0)))
    a1_strips = a1[:, strip_rows]                 # (N, RT*(TR+2), Wp+2, Cop)

    # ---- pass 2: conv2 + moments ----
    y2, s2 = conv_pass(a1_strips, w2p, Cop)
    scale2, shift2 = bn_affine(s2, g2p, b2p)

    # ---- fused XLA epilogue: BN2 + ReLU + channel un-pad + NHWC->NCHW ----
    out = jnp.maximum(y2.astype(jnp.float32) * scale2 + shift2, 0.0)
    return jnp.transpose(out[..., :Cout], (0, 3, 1, 2))


# --------------------------------------------------------------------------
# pure-JAX reference: independent conv (lax.conv_general_dilated) with the
# same precision policy as the kernel (bf16 conv operands, f32 accumulation,
# bf16 inter-layer intermediates, f32 batch-norm statistics).
# --------------------------------------------------------------------------
def _reference(x_nchw, params):
    w1, g1, b1, w2, g2, b2 = params
    N, Cin, H, W = x_nchw.shape
    x = jnp.transpose(x_nchw, (0, 2, 3, 1))
    x = jnp.max(x.reshape(N, H // 2, 2, W // 2, 2, Cin), axis=(2, 4))

    def conv_bf16(inp, w):
        y = jax.lax.conv_general_dilated(
            inp.astype(jnp.bfloat16), w.astype(jnp.bfloat16),
            window_strides=(1, 1), padding="SAME",
            dimension_numbers=("NHWC", "HWIO", "NHWC"),
            preferred_element_type=jnp.float32)
        return y.astype(jnp.bfloat16).astype(jnp.float32)   # bf16 intermediate

    def bn_relu(y, g, b):
        mean = jnp.mean(y, axis=(0, 1, 2))
        var = jnp.maximum(jnp.mean(y * y, axis=(0, 1, 2)) - mean * mean, 0.0)
        scale = g * jax.lax.rsqrt(var + BN_EPS)
        return jnp.maximum(y * scale + (b - mean * scale), 0.0)

    a1 = bn_relu(conv_bf16(x, w1), g1, b1)
    a2 = bn_relu(conv_bf16(a1, w2), g2, b2)
    return jnp.transpose(a2, (0, 3, 1, 2))


if __name__ == "__main__":
    # Small shapes: N=2, in_ch=4, out_ch=8, spatial 16x16 (output 8x8 after pool).
    N, IN_CH, OUT_CH, H, W = 2, 4, 8, 16, 16

    key = jax.random.PRNGKey(0)
    k_x, k_w1, k_w2 = jax.random.split(key, 3)

    x = jax.random.normal(k_x, (N, IN_CH, H, W), dtype=jnp.float32)
    w1 = 0.1 * jax.random.normal(k_w1, (3, 3, IN_CH, OUT_CH), dtype=jnp.float32)
    w2 = 0.1 * jax.random.normal(k_w2, (3, 3, OUT_CH, OUT_CH), dtype=jnp.float32)
    g1 = jnp.ones((OUT_CH,), jnp.float32)
    b1 = jnp.zeros((OUT_CH,), jnp.float32)
    g2 = jnp.ones((OUT_CH,), jnp.float32)
    b2 = jnp.zeros((OUT_CH,), jnp.float32)
    params = (w1, g1, b1, w2, g2, b2)

    out = jax.block_until_ready(jax.jit(down_forward)(x, params))
    ref = jax.block_until_ready(_reference(x, params))

    assert out.shape == (N, OUT_CH, H // 2, W // 2), out.shape
    # Tolerance accounts for bf16 intermediates: accumulation-order differences
    # between the kernel and lax.conv can flip a bf16 rounding (~one ulp).
    max_diff = jnp.max(jnp.abs(out - ref))
    assert jnp.allclose(out, ref, atol=2e-2, rtol=1e-2), f"max abs diff {max_diff}"

    print("KERNEL_OK")
</pallas_src>

<mosaic_0001>
module attributes {stable_mosaic.version = 11 : i64} {
  func.func @_conv_moments_kernel(%arg0: i32, %arg1: i32, %arg2: memref<1x6x10x128xbf16, #tpu.memory_space<vmem>>, %arg3: memref<9x128x128xbf16, #tpu.memory_space<vmem>>, %arg4: memref<1x4x8x128xbf16, #tpu.memory_space<vmem>>, %arg5: memref<1x1x2x128xf32, #tpu.memory_space<vmem>>) attributes {dimension_semantics = [#tpu.dimension_semantics<parallel>, #tpu.dimension_semantics<parallel>], iteration_bounds = array<i64: 2, 2>, scalar_prefetch = 0 : i64, scratch_operands = 0 : i64, tpu.core_type = #tpu.core_type<tc>, window_params = [{transform_indices = @transform_0, window_bounds = array<i64: 1, 6, 10, 128>}, {pipeline_mode = #tpu.pipeline_mode<synchronous>, transform_indices = @transform_1, window_bounds = array<i64: 9, 128, 128>}, {transform_indices = @transform_2, window_bounds = array<i64: 1, 4, 8, 128>}, {transform_indices = @transform_3, window_bounds = array<i64: 1, 1, 2, 128>}]} {
    %c0 = arith.constant 0 : index
    %c0_0 = arith.constant 0 : index
    %c0_1 = arith.constant 0 : index
    %c0_2 = arith.constant 0 : index
    %0 = vector.load %arg2[%c0, %c0_0, %c0_1, %c0_2] : memref<1x6x10x128xbf16, #tpu.memory_space<vmem>>, vector<1x4x8x128xbf16>
    %1 = vector.shape_cast %0 : vector<1x4x8x128xbf16> to vector<4x8x128xbf16>
    %2 = vector.shape_cast %1 : vector<4x8x128xbf16> to vector<32x128xbf16>
    %c0_3 = arith.constant 0 : index
    %c0_4 = arith.constant 0 : index
    %c0_5 = arith.constant 0 : index
    %3 = vector.load %arg3[%c0_3, %c0_4, %c0_5] : memref<9x128x128xbf16, #tpu.memory_space<vmem>>, vector<1x128x128xbf16>
    %4 = vector.shape_cast %3 : vector<1x128x128xbf16> to vector<128x128xbf16>
    %cst = arith.constant dense<0.000000e+00> : vector<32x128xf32>
    %5 = tpu.matmul %2, %4, %cst {dimension_numbers = #tpu.dot_dimension_numbers<[1], [0], [0], [1], [0, 0, 1, 1], [], []>} : vector<32x128xbf16>, vector<128x128xbf16>, vector<32x128xf32> -> vector<32x128xf32>
    %c0_6 = arith.constant 0 : index
    %c0_7 = arith.constant 0 : index
    %c1 = arith.constant 1 : index
    %c0_8 = arith.constant 0 : index
    %6 = vector.load %arg2[%c0_6, %c0_7, %c1, %c0_8] : memref<1x6x10x128xbf16, #tpu.memory_space<vmem>>, vector<1x4x8x128xbf16>
    %7 = vector.shape_cast %6 : vector<1x4x8x128xbf16> to vector<4x8x128xbf16>
    %8 = vector.shape_cast %7 : vector<4x8x128xbf16> to vector<32x128xbf16>
    %c1_9 = arith.constant 1 : index
    %c0_10 = arith.constant 0 : index
    %c0_11 = arith.constant 0 : index
    %9 = vector.load %arg3[%c1_9, %c0_10, %c0_11] : memref<9x128x128xbf16, #tpu.memory_space<vmem>>, vector<1x128x128xbf16>
    %10 = vector.shape_cast %9 : vector<1x128x128xbf16> to vector<128x128xbf16>
    %cst_12 = arith.constant dense<0.000000e+00> : vector<32x128xf32>
    %11 = tpu.matmul %8, %10, %cst_12 {dimension_numbers = #tpu.dot_dimension_numbers<[1], [0], [0], [1], [0, 0, 1, 1], [], []>} : vector<32x128xbf16>, vector<128x128xbf16>, vector<32x128xf32> -> vector<32x128xf32>
    %12 = arith.addf %5, %11 : vector<32x128xf32>
    %c0_13 = arith.constant 0 : index
    %c0_14 = arith.constant 0 : index
    %c2 = arith.constant 2 : index
    %c0_15 = arith.constant 0 : index
    %13 = vector.load %arg2[%c0_13, %c0_14, %c2, %c0_15] : memref<1x6x10x128xbf16, #tpu.memory_space<vmem>>, vector<1x4x8x128xbf16>
    %14 = vector.shape_cast %13 : vector<1x4x8x128xbf16> to vector<4x8x128xbf16>
    %15 = vector.shape_cast %14 : vector<4x8x128xbf16> to vector<32x128xbf16>
    %c2_16 = arith.constant 2 : index
    %c0_17 = arith.constant 0 : index
    %c0_18 = arith.constant 0 : index
    %16 = vector.load %arg3[%c2_16, %c0_17, %c0_18] : memref<9x128x128xbf16, #tpu.memory_space<vmem>>, vector<1x128x128xbf16>
    %17 = vector.shape_cast %16 : vector<1x128x128xbf16> to vector<128x128xbf16>
    %cst_19 = arith.constant dense<0.000000e+00> : vector<32x128xf32>
    %18 = tpu.matmul %15, %17, %cst_19 {dimension_numbers = #tpu.dot_dimension_numbers<[1], [0], [0], [1], [0, 0, 1, 1], [], []>} : vector<32x128xbf16>, vector<128x128xbf16>, vector<32x128xf32> -> vector<32x128xf32>
    %19 = arith.addf %12, %18 : vector<32x128xf32>
    %c0_20 = arith.constant 0 : index
    %c1_21 = arith.constant 1 : index
    %c0_22 = arith.constant 0 : index
    %c0_23 = arith.constant 0 : index
    %20 = vector.load %arg2[%c0_20, %c1_21, %c0_22, %c0_23] : memref<1x6x10x128xbf16, #tpu.memory_space<vmem>>, vector<1x4x8x128xbf16>
    %21 = vector.shape_cast %20 : vector<1x4x8x128xbf16> to vector<4x8x128xbf16>
    %22 = vector.shape_cast %21 : vector<4x8x128xbf16> to vector<32x128xbf16>
    %c3 = arith.constant 3 : index
    %c0_24 = arith.constant 0 : index
    %c0_25 = arith.constant 0 : index
    %23 = vector.load %arg3[%c3, %c0_24, %c0_25] : memref<9x128x128xbf16, #tpu.memory_space<vmem>>, vector<1x128x128xbf16>
    %24 = vector.shape_cast %23 : vector<1x128x128xbf16> to vector<128x128xbf16>
    %cst_26 = arith.constant dense<0.000000e+00> : vector<32x128xf32>
    %25 = tpu.matmul %22, %24, %cst_26 {dimension_numbers = #tpu.dot_dimension_numbers<[1], [0], [0], [1], [0, 0, 1, 1], [], []>} : vector<32x128xbf16>, vector<128x128xbf16>, vector<32x128xf32> -> vector<32x128xf32>
    %26 = arith.addf %19, %25 : vector<32x128xf32>
    %c0_27 = arith.constant 0 : index
    %c1_28 = arith.constant 1 : index
    %c1_29 = arith.constant 1 : index
    %c0_30 = arith.constant 0 : index
    %27 = vector.load %arg2[%c0_27, %c1_28, %c1_29, %c0_30] : memref<1x6x10x128xbf16, #tpu.memory_space<vmem>>, vector<1x4x8x128xbf16>
    %28 = vector.shape_cast %27 : vector<1x4x8x128xbf16> to vector<4x8x128xbf16>
    %29 = vector.shape_cast %28 : vector<4x8x128xbf16> to vector<32x128xbf16>
    %c4 = arith.constant 4 : index
    %c0_31 = arith.constant 0 : index
    %c0_32 = arith.constant 0 : index
    %30 = vector.load %arg3[%c4, %c0_31, %c0_32] : memref<9x128x128xbf16, #tpu.memory_space<vmem>>, vector<1x128x128xbf16>
    %31 = vector.shape_cast %30 : vector<1x128x128xbf16> to vector<128x128xbf16>
    %cst_33 = arith.constant dense<0.000000e+00> : vector<32x128xf32>
    %32 = tpu.matmul %29, %31, %cst_33 {dimension_numbers = #tpu.dot_dimension_numbers<[1], [0], [0], [1], [0, 0, 1, 1], [], []>} : vector<32x128xbf16>, vector<128x128xbf16>, vector<32x128xf32> -> vector<32x128xf32>
    %33 = arith.addf %26, %32 : vector<32x128xf32>
    %c0_34 = arith.constant 0 : index
    %c1_35 = arith.constant 1 : index
    %c2_36 = arith.constant 2 : index
    %c0_37 = arith.constant 0 : index
    %34 = vector.load %arg2[%c0_34, %c1_35, %c2_36, %c0_37] : memref<1x6x10x128xbf16, #tpu.memory_space<vmem>>, vector<1x4x8x128xbf16>
    %35 = vector.shape_cast %34 : vector<1x4x8x128xbf16> to vector<4x8x128xbf16>
    %36 = vector.shape_cast %35 : vector<4x8x128xbf16> to vector<32x128xbf16>
    %c5 = arith.constant 5 : index
    %c0_38 = arith.constant 0 : index
    %c0_39 = arith.constant 0 : index
    %37 = vector.load %arg3[%c5, %c0_38, %c0_39] : memref<9x128x128xbf16, #tpu.memory_space<vmem>>, vector<1x128x128xbf16>
    %38 = vector.shape_cast %37 : vector<1x128x128xbf16> to vector<128x128xbf16>
    %cst_40 = arith.constant dense<0.000000e+00> : vector<32x128xf32>
    %39 = tpu.matmul %36, %38, %cst_40 {dimension_numbers = #tpu.dot_dimension_numbers<[1], [0], [0], [1], [0, 0, 1, 1], [], []>} : vector<32x128xbf16>, vector<128x128xbf16>, vector<32x128xf32> -> vector<32x128xf32>
    %40 = arith.addf %33, %39 : vector<32x128xf32>
    %c0_41 = arith.constant 0 : index
    %c2_42 = arith.constant 2 : index
    %c0_43 = arith.constant 0 : index
    %c0_44 = arith.constant 0 : index
    %41 = vector.load %arg2[%c0_41, %c2_42, %c0_43, %c0_44] : memref<1x6x10x128xbf16, #tpu.memory_space<vmem>>, vector<1x4x8x128xbf16>
    %42 = vector.shape_cast %41 : vector<1x4x8x128xbf16> to vector<4x8x128xbf16>
    %43 = vector.shape_cast %42 : vector<4x8x128xbf16> to vector<32x128xbf16>
    %c6 = arith.constant 6 : index
    %c0_45 = arith.constant 0 : index
    %c0_46 = arith.constant 0 : index
    %44 = vector.load %arg3[%c6, %c0_45, %c0_46] : memref<9x128x128xbf16, #tpu.memory_space<vmem>>, vector<1x128x128xbf16>
    %45 = vector.shape_cast %44 : vector<1x128x128xbf16> to vector<128x128xbf16>
    %cst_47 = arith.constant dense<0.000000e+00> : vector<32x128xf32>
    %46 = tpu.matmul %43, %45, %cst_47 {dimension_numbers = #tpu.dot_dimension_numbers<[1], [0], [0], [1], [0, 0, 1, 1], [], []>} : vector<32x128xbf16>, vector<128x128xbf16>, vector<32x128xf32> -> vector<32x128xf32>
    %47 = arith.addf %40, %46 : vector<32x128xf32>
    %c0_48 = arith.constant 0 : index
    %c2_49 = arith.constant 2 : index
    %c1_50 = arith.constant 1 : index
    %c0_51 = arith.constant 0 : index
    %48 = vector.load %arg2[%c0_48, %c2_49, %c1_50, %c0_51] : memref<1x6x10x128xbf16, #tpu.memory_space<vmem>>, vector<1x4x8x128xbf16>
    %49 = vector.shape_cast %48 : vector<1x4x8x128xbf16> to vector<4x8x128xbf16>
    %50 = vector.shape_cast %49 : vector<4x8x128xbf16> to vector<32x128xbf16>
    %c7 = arith.constant 7 : index
    %c0_52 = arith.constant 0 : index
    %c0_53 = arith.constant 0 : index
    %51 = vector.load %arg3[%c7, %c0_52, %c0_53] : memref<9x128x128xbf16, #tpu.memory_space<vmem>>, vector<1x128x128xbf16>
    %52 = vector.shape_cast %51 : vector<1x128x128xbf16> to vector<128x128xbf16>
    %cst_54 = arith.constant dense<0.000000e+00> : vector<32x128xf32>
    %53 = tpu.matmul %50, %52, %cst_54 {dimension_numbers = #tpu.dot_dimension_numbers<[1], [0], [0], [1], [0, 0, 1, 1], [], []>} : vector<32x128xbf16>, vector<128x128xbf16>, vector<32x128xf32> -> vector<32x128xf32>
    %54 = arith.addf %47, %53 : vector<32x128xf32>
    %c0_55 = arith.constant 0 : index
    %c2_56 = arith.constant 2 : index
    %c2_57 = arith.constant 2 : index
    %c0_58 = arith.constant 0 : index
    %55 = vector.load %arg2[%c0_55, %c2_56, %c2_57, %c0_58] : memref<1x6x10x128xbf16, #tpu.memory_space<vmem>>, vector<1x4x8x128xbf16>
    %56 = vector.shape_cast %55 : vector<1x4x8x128xbf16> to vector<4x8x128xbf16>
    %57 = vector.shape_cast %56 : vector<4x8x128xbf16> to vector<32x128xbf16>
    %c8 = arith.constant 8 : index
    %c0_59 = arith.constant 0 : index
    %c0_60 = arith.constant 0 : index
    %58 = vector.load %arg3[%c8, %c0_59, %c0_60] : memref<9x128x128xbf16, #tpu.memory_space<vmem>>, vector<1x128x128xbf16>
    %59 = vector.shape_cast %58 : vector<1x128x128xbf16> to vector<128x128xbf16>
    %cst_61 = arith.constant dense<0.000000e+00> : vector<32x128xf32>
    %60 = tpu.matmul %57, %59, %cst_61 {dimension_numbers = #tpu.dot_dimension_numbers<[1], [0], [0], [1], [0, 0, 1, 1], [], []>} : vector<32x128xbf16>, vector<128x128xbf16>, vector<32x128xf32> -> vector<32x128xf32>
    %61 = arith.addf %54, %60 : vector<32x128xf32>
    %62 = arith.truncf %61 : vector<32x128xf32> to vector<32x128xbf16>
    %63 = vector.shape_cast %62 : vector<32x128xbf16> to vector<4x8x128xbf16>
    %c0_62 = arith.constant 0 : index
    %c0_63 = arith.constant 0 : index
    %c0_64 = arith.constant 0 : index
    %c0_65 = arith.constant 0 : index
    %64 = vector.load %arg4[%c0_62, %c0_63, %c0_64, %c0_65] : memref<1x4x8x128xbf16, #tpu.memory_space<vmem>>, vector<1x4x8x128xbf16>
    %65 = vector.shape_cast %64 : vector<1x4x8x128xbf16> to vector<4x8x128xbf16>
    %66 = vector.shape_cast %63 : vector<4x8x128xbf16> to vector<1x4x8x128xbf16>
    tpu.vector_store %arg4[%c0_62, %c0_63, %c0_64, %c0_65], %66 {strides = array<i32>} : memref<1x4x8x128xbf16, #tpu.memory_space<vmem>>, vector<1x4x8x128xbf16>,
    %67 = arith.extf %62 : vector<32x128xbf16> to vector<32x128xf32>
    %cst_66 = arith.constant dense<0.000000e+00> : vector<128xf32>
    %68 = vector.multi_reduction <add>, %67, %cst_66 [0] : vector<32x128xf32> to vector<128xf32>
    %69 = vector.shape_cast %68 : vector<128xf32> to vector<1x128xf32>
    %70 = arith.mulf %67, %67 : vector<32x128xf32>
    %cst_67 = arith.constant dense<0.000000e+00> : vector<128xf32>
    %71 = vector.multi_reduction <add>, %70, %cst_67 [0] : vector<32x128xf32> to vector<128xf32>
    %72 = vector.shape_cast %71 : vector<128xf32> to vector<1x128xf32>
    %73 = tpu.concatenate %69, %72 in 0 : vector<1x128xf32>, vector<1x128xf32> -> vector<2x128xf32>
    %c0_68 = arith.constant 0 : index
    %c0_69 = arith.constant 0 : index
    %c0_70 = arith.constant 0 : index
    %c0_71 = arith.constant 0 : index
    %74 = vector.load %arg5[%c0_68, %c0_69, %c0_70, %c0_71] : memref<1x1x2x128xf32, #tpu.memory_space<vmem>>, vector<1x1x2x128xf32>
    %75 = vector.shape_cast %74 : vector<1x1x2x128xf32> to vector<2x128xf32>
    %76 = vector.shape_cast %73 : vector<2x128xf32> to vector<1x1x2x128xf32>
    tpu.vector_store %arg5[%c0_68, %c0_69, %c0_70, %c0_71], %76 {strides = array<i32>} : memref<1x1x2x128xf32, #tpu.memory_space<vmem>>, vector<1x1x2x128xf32>,
    return
  }
  func.func @transform_0(%arg0: i32, %arg1: i32) -> (i32, i32, i32, i32) {
    %c0_i32 = arith.constant 0 : i32
    %c0_i32_0 = arith.constant 0 : i32
    %c0_i32_1 = arith.constant 0 : i32
    return %arg0, %arg1, %c0_i32, %c0_i32_0 : i32, i32, i32, i32
  }
  func.func @transform_1(%arg0: i32, %arg1: i32) -> (i32, i32, i32) {
    %c0_i32 = arith.constant 0 : i32
    %c0_i32_0 = arith.constant 0 : i32
    %c0_i32_1 = arith.constant 0 : i32
    %c0_i32_2 = arith.constant 0 : i32
    return %c0_i32, %c0_i32_0, %c0_i32_1 : i32, i32, i32
  }
  func.func @transform_2(%arg0: i32, %arg1: i32) -> (i32, i32, i32, i32) {
    %c0_i32 = arith.constant 0 : i32
    %c0_i32_0 = arith.constant 0 : i32
    %c0_i32_1 = arith.constant 0 : i32
    return %arg0, %arg1, %c0_i32, %c0_i32_0 : i32, i32, i32, i32
  }
  func.func @transform_3(%arg0: i32, %arg1: i32) -> (i32, i32, i32, i32) {
    %c0_i32 = arith.constant 0 : i32
    %c0_i32_0 = arith.constant 0 : i32
    %c0_i32_1 = arith.constant 0 : i32
    return %arg0, %arg1, %c0_i32, %c0_i32_0 : i32, i32, i32, i32
  }
}

</mosaic_0001>

<bundles_post_ra>
// kernel: down_forward.2
= control target key start
LH: loop header
LB: loop body
LE: loop exit
PB: predicated region body
PF: predicated region fallthrough
CT: control target
= control target key end

     0   :  { %s2266_s12 = smov 0   ;;  %s2268_s13 = smov 0   ;;  %s2681_s0 = inlined_call_operand.vmem [shape: bf16[2,12,10,128], index: 0, kind: input, shape index: {}]   ;;  %s2682_s1 = inlined_call_operand.vmem [shape: bf16[9,128,128], index: 1, kind: input, shape index: {}]   ;;  %s2683_s2 = inlined_call_operand.vmem [shape: bf16[2,8,8,128], index: 2, kind: output, shape index: {0}]   ;;  %s2684_s3 = inlined_call_operand.vmem [shape: f32[2,2,2,128], index: 3, kind: output, shape index: {1}]  }
   0x1   :  { %s2270_s14 = smov 0   ;;  %s2272_s15 = smov 0  }
   0x2   :  { %s2274_s16 = smov 0  }
   0x3 LB: > { %s23_s17 = sadd.s32 1, %s2236_s14  ;;  %s26_s18 = sadd.s32 1, %s2240_s15  ;;  %s2244_s16 = sphi %s2274_s16, %s14_s16   ;;  %s2240_s15 = sphi %s2272_s15, %s2692_s15   ;;  %s2236_s14 = sphi %s2270_s14, %s2691_s14   ;;  %s2232_s13 = sphi %s2268_s13, %s2690_s13   ;;  %s2228_s12 = sphi %s2266_s12, %s2689_s12  }
   0x4   : > { %p24_p0 = scmp.ge.s32.totalorder %s23_s17, 2  ;;  %p1574_p1 = scmp.ge.s32.totalorder %s2244_s16, 1 }
   0x5   : > { %p164_p2 = scmp.lt.s32.totalorder %s2244_s16, 5 }
   0x6   : > { %s2694_s17 = smov (%p24_p0, %s23_s17), 0  ;;  %s2696_s18 = smov (!%p24_p0, %s26_s18), %s2240_s15 }
   0x7   : > { %p165_p3 = pnand %p1574_p1, %p164_p2  ;;  %p28_p4 = scmp.ge.s32.totalorder %s2696_s18, 2 }
   0x8   : > { %s205_s25 = smul.u32 (!%p165_p3), 6, %s2228_s12  ;;  %p206_p5 = scmp.lt.s32.totalorder (!%p165_p3), %s2232_s13, 1 }
   0x9   : > { %s2698_s18 = smov (%p28_p4, %s2696_s18), 0  ;;  %168 = sbr.rel (%p165_p3) target bundleno = 272 (0x110), region = 28 }
   0xa   : > { %p208_p6 = scmp.lt.s32.totalorder (!%p165_p3), %s205_s25, 11  ;;  %s1577_s10 = sshll.u32 (!%p165_p3), %s2228_s12, 2 }
   0xb   : > { %p219_p7 = scmp.lt.s32.totalorder (!%p165_p3), %s1577_s10, 7  ;;  %p228_p8 = scmp.lt.s32.totalorder (!%p165_p3), %s2228_s12, 1 }
   0xe   : > { %v2085_v0 = vld [vmem:[%s2682_s1 + $0x78] sm:$0xff]  ;;  %v2084_v4 = vld [vmem:[%s2682_s1 + $0x70] sm:$0xff]  ;;  %s2700_s13 = smov (!%p206_p5, %s2232_s13), 1  ;;  %s2702_s25 = smov (!%p208_p6, %s205_s25), 11  ;;  %v2083_v8 = vld [vmem:[%s2682_s1 + $0x68] sm:$0xff]  ;;  %vm500_vm2 = vcmask 1042432  }
   0xf   : > { %v2077_v1 = vld [vmem:[%s2682_s1 + $0x38] sm:$0xff]  ;;  %390 = vmatpush.bf16.msra.mxu0 %v2085_v0  ;;  %v2076_v5 = vld [vmem:[%s2682_s1 + $0x30] sm:$0xff]  ;;  %s2165_s9 = smul.u32 24, %s2700_s13  ;;  %v2075_v9 = vld [vmem:[%s2682_s1 + $0x28] sm:$0xff]  ;;  %s1575_s26 = sshll.u32 %s2702_s25, 1  ;;  %vm501_vm3 = vcmask 1046532  }
  0x10   : > { %v2093_v2 = vld [vmem:[%s2682_s1 + $0xb8] sm:$0xff]  ;;  %469 = vmatpush.bf16.msra.mxu1 %v2077_v1  ;;  %v2092_v6 = vld [vmem:[%s2682_s1 + $0xb0] sm:$0xff]  ;;  %v2091_v10 = vld [vmem:[%s2682_s1 + $0xa8] sm:$0xff]  ;;  %vm258_vm0 = vsmask.f32 3328  ;;  %s2704_s10 = smov (!%p219_p7, %s1577_s10), 7 }
  0x11   : > { %v2103_v3 = vld [vmem:[%s2682_s1 + $0xf8] sm:$0xff]  ;;  %592 = vmatpush.bf16.msra.mxu2 %v2093_v2  ;;  %v2102_v7 = vld [vmem:[%s2682_s1 + $0xf0] sm:$0xff]  ;;  %v2101_v11 = vld [vmem:[%s2682_s1 + $0xe8] sm:$0xff]  ;;  %s212_s27 = sadd.s32 %s2165_s9, %s1575_s26  ;;  %vm259_vm1 = vsmask.f32 7440  ;;  %s1578_s25 = sshll.u32 %s2700_s13, 3 }
  0x12   : > { %697 = vmatpush.bf16.msra.mxu3 %v2103_v3  ;;  %v2082_v12 = vld [vmem:[%s2682_s1 + $0x60] sm:$0xff]  ;;  %s1576_s30 = sshll.u32 %s212_s27, 2  ;;  %v2081_v25 = vld [vmem:[%s2682_s1 + $0x58] sm:$0xff]  ;;  %v2080_v39 = vld [vmem:[%s2682_s1 + $0x50] sm:$0xff]  ;;  %s222_s9 = sadd.s32 %s1578_s25, %s2704_s10  ;;  %vm1427_vm6 = vcmask 1040384  }
  0x13   : > { %391 = vmatpush.bf16.msra.mxu0 %v2084_v4  ;;  %v2074_v13 = vld [vmem:[%s2682_s1 + $0x20] sm:$0xff]  ;;  %s2353_s11 = scalar_lea.vmem %s2681_s0, %s1576_s30  ;;  %v2073_v26 = vld [vmem:[%s2682_s1 + $0x18] sm:$0xff]  ;;  %v2072_v40 = vld [vmem:[%s2682_s1 + $0x10] sm:$0xff]  ;;  %s1579_s19 = sshll.u32 %s222_s9, 2 }
  0x14   : > { %470 = vmatpush.bf16.msra.mxu1 %v2076_v5  ;;  %v2090_v14 = vld [vmem:[%s2682_s1 + $0xa0] sm:$0xff]  ;;  %v235_v17 = vld [vmem:[%s2353_s11 + $0x8] sm:$0xf]  ;;  %v255_v19 = vld [vmem:[%s2353_s11 + $0xc] sm:$0x1]  ;;  %s224_s22 = scalar_lea.vmem %s2683_s2, %s1579_s19  ;;  %s2706_s12 = smov (!%p228_p8, %s2228_s12), 1 }
  0x15   : > { %593 = vmatpush.bf16.msra.mxu2 %v2092_v6  ;;  %v2100_v15 = vld [vmem:[%s2682_s1 + $0xe0] sm:$0xff]  ;;  %v276_v22 = vshrl.u32 %v235_v17, 16  ;;  %v279_v24 = vshll.u32 %v235_v17, 16  ;;  %v285_v30 = vshll.u32 %v255_v19, 16  ;;  %v2089_v31 = vld [vmem:[%s2682_s1 + $0x98] sm:$0xff]  ;;  %vm2381_vm4 = vmor %vm258_vm0, %vm259_vm1  ;;  %v509_v51 = vrot.slane %v255_v19, 5 }
  0x16   : > { %698 = vmatpush.bf16.msra.mxu3 %v2102_v7  ;;  %v234_v16 = vld [vmem:[%s2353_s11] sm:$0xf]  ;;  %v254_v18 = vld [vmem:[%s2353_s11 + $0x4] sm:$0x1]  ;;  %v2099_v32 = vld [vmem:[%s2682_s1 + $0xd8] sm:$0xff]  ;;  %s1580_s23 = sshll.u32 %s2700_s13, 1 }
  0x17   : > { %392 = vmatpush.bf16.msra.mxu0 %v2083_v8  ;;  %v262_v20 = vshrl.u32 %v234_v16, 16  ;;  %v265_v21 = vshll.u32 %v234_v16, 16  ;;  %v271_v23 = vshll.u32 %v254_v18, 16  ;;  %v278_v29 = vrot.slane %v276_v22, 4  ;;  %v488_v34 = vld [vmem:[%s2353_s11] sm:$0xe]  ;;  %vm2393_vm5 = vmor %vm500_vm2, %vm501_vm3  ;;  %s231_s24 = sadd.s32 %s1580_s23, %s2706_s12 }
  0x18   : > { %471 = vmatpush.bf16.msra.mxu1 %v2075_v9  ;;  %v281_v33 = vrot.slane %v279_v24, 5  ;;  %v489_v36 = vld [vmem:[%s2353_s11 + $0x8] sm:$0xe]  ;;  %v287_v43 = vrot.slane %v285_v30, 5  ;;  %v1670_v44 = vrot.slane %v488_v34, 9  ;;  %v505_v45 = vrot.slane %v254_v18, 5 }
  0x19   : > { %594 = vmatpush.bf16.msra.mxu2 %v2091_v10  ;;  %v264_v27 = vrot.slane %v262_v20, 4  ;;  %v267_v28 = vrot.slane %v265_v21, 5  ;;  %v273_v37 = vrot.slane %v271_v23, 5  ;;  %v2088_v46 = vld [vmem:[%s2682_s1 + $0x90] sm:$0xff]  ;;  %v1671_v50 = vrot.slane %v489_v36, 9  ;;  %v2079_v53 = vld [vmem:[%s2682_s1 + $0x48] sm:$0xff] }
  0x1a   : > { %699 = vmatpush.bf16.msra.mxu3 %v2101_v11  ;;  %v282_v38 = vor.u32 %v281_v33, %v278_v29  ;;  %v2098_v47 = vld [vmem:[%s2682_s1 + $0xd0] sm:$0xff]  ;;  %v2071_v54 = vld [vmem:[%s2682_s1 + $0x8] sm:$0xff]  ;;  %v506_v57 = vsel %vm2393_vm5, %v1670_v44, %v505_v45  ;;  %v237_v58 = vld [vmem:[%s2353_s11 + $0x18] sm:$0xf]  ;;  %s1581_s26 = sshll.u32 %s231_s24, 1 }
  0x1b   : > { %393 = vmatpush.bf16.msra.mxu0 %v2082_v12  ;;  %v268_v35 = vor.u32 %v267_v28, %v264_v27  ;;  %v236_v52 = vld [vmem:[%s2353_s11 + $0x10] sm:$0xf]  ;;  %v2087_v59 = vld [vmem:[%s2682_s1 + $0x88] sm:$0xff]  ;;  %v510_v61 = vsel %vm2393_vm5, %v1671_v50, %v509_v51  ;;  %v304_v0 = vshrl.u32 %v237_v58, 16  ;;  %v2078_v1 = vld [vmem:[%s2682_s1 + $0x40] sm:$0xff]  ;;  %v307_v3 = vshll.u32 %v237_v58, 16  ;;  %s233_s29 = scalar_lea.vmem %s2684_s3, %s1581_s26 }
  0x1c   : > { %472 = vmatpush.bf16.msra.mxu1 %v2074_v13  ;;  %v283_v48 = vrot.slane %v282_v38, 4  ;;  %v2097_v60 = vld [vmem:[%s2682_s1 + $0xc8] sm:$0xff]  ;;  %v290_v62 = vshrl.u32 %v236_v52, 16  ;;  %v293_v63 = vshll.u32 %v236_v52, 16  ;;  %v2070_v2 = vld [vmem:[%s2682_s1] sm:$0xff]  ;;  %v536_v12 = vunpack.c.l.b16 %v506_v57  ;;  %v2111_v20 = vld [vmem:[%s2682_s1 + $0x138] sm:$0xff] }
  0x1d   : > { %595 = vmatpush.bf16.msra.mxu2 %v2090_v14  ;;  %v269_v42 = vrot.slane %v268_v35, 4  ;;  %v2086_v4 = vld [vmem:[%s2682_s1 + $0x80] sm:$0xff]  ;;  %v2068_v11 = vld [vmem:[%s2353_s11 + $0x4] sm:$0xf0]  ;;  %v537_v13 = vunpack.c.l.b16 %v510_v61  ;;  %v256_v14 = vld [vmem:[%s2353_s11 + $0x14] sm:$0x1] }
  0x1e   : > { %700 = vmatpush.bf16.msra.mxu3 %v2100_v15  ;;  %v288_v56 = vsel %vm2381_vm4, %v283_v48, %v287_v43  ;;  %v2096_v5 = vld [vmem:[%s2682_s1 + $0xc0] sm:$0xff]  ;;  %v292_v9 = vrot.slane %v290_v62, 4  ;;  %v295_v10 = vrot.slane %v293_v63, 5  ;;  %v306_v15 = vrot.slane %v304_v0, 4  ;;  %v1744_v17 = vld [vmem:[%s2353_s11 + $0x8] sm:$0xf] }
  0x1f   : > { %394 = vmatpush.bf16.msra.mxu0 %v2081_v25  ;;  %v274_v55 = vsel %vm2381_vm4, %v269_v42, %v273_v37  ;;  %v335_v7 = vunpack.c.l.b16 %v288_v56  ;;  %v1632_v8 = vld [vmem:[%s2353_s11] sm:$0xf]  ;;  %v309_v16 = vrot.slane %v307_v3, 5  ;;  %v2094_v18 = vld [vmem:[%s2353_s11 + $0xc] sm:$0xf0]  ;;  %v2119_v21 = vld [vmem:[%s2682_s1 + $0x178] sm:$0xff]  ;;  %v540_v27 = vpack.c.b16 %v537_v13, %v536_v12 }
  0x20   : > { %473 = vmatpush.bf16.msra.mxu1 %v2073_v26  ;;  %v334_v6 = vunpack.c.l.b16 %v274_v55  ;;  %v257_v19 = vld [vmem:[%s2353_s11 + $0x1c] sm:$0x1]  ;;  %v1633_v23 = vor.u32 %v2068_v11, %v1632_v8  ;;  %v296_v24 = vor.u32 %v295_v10, %v292_v9  ;;  %v299_v25 = vshll.u32 %v256_v14, 16  ;;  %v490_v26 = vld [vmem:[%s2353_s11 + $0x10] sm:$0xe]  ;;  %v2109_v50 = vld [vmem:[%s2682_s1 + $0x128] sm:$0xff] }
  0x21   : > { %596 = vmatpush.bf16.msra.mxu2 %v2089_v31  ;;  %v1745_v28 = vor.u32 %v2094_v18, %v1744_v17  ;;  %v310_v29 = vor.u32 %v309_v16, %v306_v15  ;;  %v313_v30 = vshll.u32 %v257_v19, 16  ;;  %v491_v31 = vld [vmem:[%s2353_s11 + $0x18] sm:$0xe]  ;;  %v2110_v34 = vld [vmem:[%s2682_s1 + $0x130] sm:$0xff]  ;;  %v1672_v36 = vrot.slane %v490_v26, 9  ;;  %v2117_v51 = vld [vmem:[%s2682_s1 + $0x168] sm:$0xff] }
  0x22   : > { %701 = vmatpush.bf16.msra.mxu3 %v2099_v32  ;;  %v338_v22 = vpack.c.b16 %v335_v7, %v334_v6  ;;  %v2129_v32 = vld [vmem:[%s2682_s1 + $0x1b8] sm:$0xff]  ;;  %v2118_v35 = vld [vmem:[%s2682_s1 + $0x170] sm:$0xff]  ;;  %v513_v37 = vrot.slane %v256_v14, 5  ;;  %v297_v38 = vrot.slane %v296_v24, 4  ;;  %v517_v42 = vrot.slane %v257_v19, 5  ;;  %v2135_v63 = vld [vmem:[%s2682_s1 + $0x1e8] sm:$0xff] }
  0x23   : > { %395 = vmatpush.bf16.msra.mxu0 %v2080_v39  ;;  %v2137_v33 = vld [vmem:[%s2682_s1 + $0x1f8] sm:$0xff]  ;;  %v301_v39 = vrot.slane %v299_v25, 5  ;;  %v311_v43 = vrot.slane %v310_v29, 4  ;;  %v315_v44 = vrot.slane %v313_v30, 5  ;;  %v1782_v45 = vld [vmem:[%s2353_s11 + $0x8] sm:$0xf] }
  0x24   : > { %474 = vmatpush.bf16.msra.mxu1 %v2072_v40  ;;  %v1673_v40 = vrot.slane %v491_v31, 9  ;;  %v1784_v48 = vld [vmem:[%s2353_s11 + $0x10] sm:$0xf]  ;;  %v514_v52 = vsel %vm2393_vm5, %v1672_v36, %v513_v37  ;;  %v729_v56 = vshrl.u32 %v1782_v45, 16  ;;  %v732_v57 = vshll.u32 %v1782_v45, 16  ;;  %v2108_v0 = vld [vmem:[%s2682_s1 + $0x120] sm:$0xff] }
  0x25   : > { %597 = vmatpush.bf16.msra.mxu2 %v2088_v46  ;;  %v2128_v46 = vld [vmem:[%s2682_s1 + $0x1b0] sm:$0xff]  ;;  %v316_v58 = vsel %vm2381_vm4, %v311_v43, %v315_v44  ;;  %v1956_v62 = vld [vmem:[%s2353_s11 + $0x18] sm:$0xf]  ;;  %v2116_v3 = vld [vmem:[%s2682_s1 + $0x160] sm:$0xff]  ;;  %v538_v6 = vunpack.c.l.b16 %v514_v52 }
  0x26   : > { %702 = vmatpush.bf16.msra.mxu3 %v2098_v47  ;;  %v2136_v47 = vld [vmem:[%s2682_s1 + $0x1f0] sm:$0xff]  ;;  %v518_v55 = vsel %vm2393_vm5, %v1673_v40, %v517_v42  ;;  %v1748_v8 = vld [vmem:[%s2353_s11 + $0x18] sm:$0xf]  ;;  %v2126_v10 = vld [vmem:[%s2682_s1 + $0x1a0] sm:$0xff]  ;;  %v337_v12 = vunpack.c.l.b16 %v316_v58  ;;  %v731_v14 = vrot.slane %v729_v56, 4  ;;  %v734_v15 = vrot.slane %v732_v57, 5 }
  0x27   : > { %396 = vmatpush.bf16.msra.mxu0 %v2079_v53  ;;  %v2127_v53 = vld [vmem:[%s2682_s1 + $0x1a8] sm:$0xff]  ;;  %v1954_v61 = vld [vmem:[%s2353_s11 + $0x10] sm:$0xf]  ;;  %v539_v7 = vunpack.c.l.b16 %v518_v55  ;;  %v2134_v11 = vld [vmem:[%s2682_s1 + $0x1e0] sm:$0xff]  ;;  %v1132_v16 = vshrl.u32 %v1956_v62, 16  ;;  %v1135_v25 = vshll.u32 %v1956_v62, 16 }
  0x28   : > { %475 = vmatpush.bf16.msra.mxu1 %v2071_v54  ;;  %v302_v54 = vsel %vm2381_vm4, %v297_v38, %v301_v39  ;;  %v1121_v9 = vshll.u32 %v1954_v61, 16  ;;  %v2095_v13 = vld [vmem:[%s2353_s11 + $0x1c] sm:$0xf0]  ;;  %v2504_v17 = vld [vmem:[%s2353_s11 + $0xc] sm:$0x1]  ;;  %v2115_v29 = vld [vmem:[%s2682_s1 + $0x158] sm:$0xff] }
  0x29   : > { %598 = vmatpush.bf16.msra.mxu2 %v2087_v59  ;;  %v743_v59 = vshrl.u32 %v1784_v48, 16  ;;  %v1134_v24 = vrot.slane %v1132_v16, 4  ;;  %v1749_v30 = vor.u32 %v2095_v13, %v1748_v8  ;;  %v2519_v31 = vld [vmem:[%s2353_s11 + $0x1c] sm:$0x1]  ;;  %v1137_v36 = vrot.slane %v1135_v25, 5  ;;  %v2124_v52 = vld [vmem:[%s2682_s1 + $0x190] sm:$0xff] }
  0x2a   : > { %703 = vmatpush.bf16.msra.mxu3 %v2097_v60  ;;  %v746_v60 = vshll.u32 %v1784_v48, 16  ;;  %v1839_v39 = vld [vmem:[%s2353_s11 + $0x10] sm:$0xe]  ;;  %v2125_v43 = vld [vmem:[%s2682_s1 + $0x198] sm:$0xff]  ;;  %v2131_v16 = vld [vmem:[%s2682_s1 + $0x1c8] sm:$0xff] }
  0x2b   : > { %397 = vmatpush.bf16.msra.mxu0 %v2078_v1  ;;  %v1636_v1 = vld [vmem:[%s2353_s11 + $0x10] sm:$0xf]  ;;  %v745_v18 = vrot.slane %v743_v59, 4  ;;  %v2133_v44 = vld [vmem:[%s2682_s1 + $0x1d8] sm:$0xff]  ;;  %v1138_v45 = vor.u32 %v1137_v36, %v1134_v24  ;;  %v1843_v55 = vrot.slane %v1839_v39, 9 }
  0x2c   : > { %476 = vmatpush.bf16.msra.mxu1 %v2070_v2  ;;  %v1118_v2 = vshrl.u32 %v1954_v61, 16  ;;  %v748_v19 = vrot.slane %v746_v60, 5  ;;  %v2114_v48 = vld [vmem:[%s2682_s1 + $0x150] sm:$0xff]  ;;  %v1786_v61 = vld [vmem:[%s2353_s11 + $0x18] sm:$0xf] }
  0x2d   : > { %599 = vmatpush.bf16.msra.mxu2 %v2086_v4  ;;  %v336_v4 = vunpack.c.l.b16 %v302_v54  ;;  %v2132_v62 = vld [vmem:[%s2682_s1 + $0x1d0] sm:$0xff]  ;;  %v1789_v39 = vld [vmem:[%s2353_s11 + $0x24] sm:$0x1] }
  0x2e   : > { %704 = vmatpush.bf16.msra.mxu3 %v2096_v5  ;;  %398 = vmatmul.bf16.vlgmr.msra.gmra.mxu0 %v338_v22  ;;  %v2069_v5 = vld [vmem:[%s2353_s11 + $0x14] sm:$0xf0]  ;;  %v2507_v22 = vld [vmem:[%s2353_s11 + $0x14] sm:$0x1]  ;;  %v749_v37 = vor.u32 %v748_v19, %v745_v18 }
  0x2f   : > { %857 = vmatpush.bf16.msrb.mxu0 %v2111_v20  ;;  %477 = vmatmul.bf16.vlgmr.msra.gmra.mxu1 %v1633_v23  ;;  %v1120_v20 = vrot.slane %v1118_v2, 4  ;;  %v2510_v23 = vld [vmem:[%s2353_s11 + $0x14] sm:$0x1]  ;;  %v1637_v26 = vor.u32 %v2069_v5, %v1636_v1  ;;  %v752_v38 = vshll.u32 %v2507_v22, 16  ;;  %v898_v56 = vrot.slane %v2507_v22, 5  ;;  %v2112_v22 = vld [vmem:[%s2682_s1 + $0x140] sm:$0xff] }
  0x30   : > { %981 = vmatpush.bf16.msrb.mxu1 %v2119_v21  ;;  %600 = vmatmul.bf16.vlgmr.msra.gmra.mxu2 %v540_v27  ;;  %v1123_v21 = vrot.slane %v1121_v9, 5  ;;  %v541_v27 = vpack.c.b16 %v539_v7, %v538_v6  ;;  %v1127_v42 = vshll.u32 %v2510_v23, 16  ;;  %v750_v57 = vrot.slane %v749_v37, 4  ;;  %v1788_v2 = vld [vmem:[%s2353_s11 + $0x20] sm:$0xf] }
  0x31   : > { %705 = vmatmul.bf16.vlgmr.msra.gmra.mxu3 %v1745_v28  ;;  %1086 = vmatpush.bf16.msrb.mxu2 %v2129_v32  ;;  %v2107_v28 = vld [vmem:[%s2682_s1 + $0x118] sm:$0xff]  ;;  %v339_v32 = vpack.c.b16 %v337_v12, %v336_v4  ;;  %v754_v58 = vrot.slane %v752_v38, 5  ;;  %v1958_v5 = vld [vmem:[%s2353_s11 + $0x20] sm:$0xf]  ;;  %v1960_v6 = vld [vmem:[%s2353_s11 + $0x28] sm:$0xf]  ;;  %v899_v8 = vsel %vm2393_vm5, %v1843_v55, %v898_v56 }
  0x32   : > { %1246 = vmatpush.bf16.msrb.mxu3 %v2137_v33  ;;  %v735_v33 = vor.u32 %v734_v15, %v731_v14  ;;  %v1124_v40 = vor.u32 %v1123_v21, %v1120_v20  ;;  %v1129_v60 = vrot.slane %v1127_v42, 5  ;;  %v757_v9 = vshrl.u32 %v1786_v61, 16  ;;  %v2123_v15 = vld [vmem:[%s2682_s1 + $0x188] sm:$0xff]  ;;  %v2104_v21 = vld [vmem:[%s2682_s1 + $0x100] sm:$0xff]  ;;  %v1787_v38 = vld [vmem:[%s2353_s11 + $0x1c] sm:$0x1] }
  0x33   : > { %858 = vmatpush.bf16.msrb.mxu0 %v2110_v34  ;;  %v738_v34 = vshll.u32 %v2504_v17, 16  ;;  %v771_v13 = vshrl.u32 %v1788_v2, 16  ;;  %v774_v14 = vshll.u32 %v1788_v2, 16  ;;  %v1146_v18 = vshrl.u32 %v1958_v5, 16 }
  0x34   : > { %982 = vmatpush.bf16.msrb.mxu1 %v2118_v35  ;;  %v1838_v35 = vld [vmem:[%s2353_s11 + $0x8] sm:$0xe]  ;;  %v1125_v59 = vrot.slane %v1124_v40, 4  ;;  %v1149_v19 = vshll.u32 %v1958_v5, 16  ;;  %v1160_v20 = vshrl.u32 %v1960_v6, 16  ;;  %v926_v25 = vunpack.c.l.b16 %v899_v8 }
  0x35   : > { %1087 = vmatpush.bf16.msrb.mxu2 %v2128_v46  ;;  %v1141_v46 = vshll.u32 %v2519_v31, 16  ;;  %v740_v54 = vrot.slane %v738_v34, 5  ;;  %v759_v34 = vrot.slane %v757_v9, 4  ;;  %v773_v40 = vrot.slane %v771_v13, 4 }
  0x36   : > { %1247 = vmatpush.bf16.msrb.mxu3 %v2136_v47  ;;  %v2106_v47 = vld [vmem:[%s2682_s1 + $0x110] sm:$0xff]  ;;  %v1130_v12 = vsel %vm2381_vm4, %v1125_v59, %v1129_v60  ;;  %v776_v42 = vrot.slane %v774_v14, 5  ;;  %v1840_v59 = vld [vmem:[%s2353_s11 + $0x18] sm:$0xe]  ;;  %v902_v5 = vrot.slane %v1787_v38, 5  ;;  %v906_v9 = vrot.slane %v1789_v39, 5 }
  0x37   : > { %859 = vmatpush.bf16.msrb.mxu0 %v2109_v50  ;;  %v1842_v50 = vrot.slane %v1838_v35, 9  ;;  %v1143_v1 = vrot.slane %v1141_v46, 5  ;;  %v1190_v36 = vunpack.c.l.b16 %v1130_v12  ;;  %v1162_v46 = vrot.slane %v1160_v20, 4  ;;  %v2144_v60 = vld [vmem:[%s2682_s1 + $0x230] sm:$0xff] }
  0x38   : > { %983 = vmatpush.bf16.msrb.mxu1 %v2117_v51  ;;  %v894_v51 = vrot.slane %v2504_v17, 5 }
  0x39   : > { %1088 = vmatpush.bf16.msrb.mxu2 %v2127_v53  ;;  %v736_v53 = vrot.slane %v735_v33, 4  ;;  %v2145_v33 = vld [vmem:[%s2682_s1 + $0x238] sm:$0xff] }
  0x3a   : > { %1248 = vmatpush.bf16.msrb.mxu3 %v2135_v63  ;;  %v2105_v63 = vld [vmem:[%s2682_s1 + $0x108] sm:$0xff]  ;;  %v895_v4 = vsel %vm2393_vm5, %v1842_v50, %v894_v51 }
  0x3b   : > { %860 = vmatpush.bf16.msrb.mxu0 %v2108_v0  ;;  %v1139_v0 = vrot.slane %v1138_v45, 4  ;;  %v741_v7 = vsel %vm2381_vm4, %v736_v53, %v740_v54  ;;  %v925_v24 = vunpack.c.l.b16 %v895_v4  ;;  %v1151_v45 = vrot.slane %v1149_v19, 5  ;;  %v2598_v50 = vld [vmem:[%s2353_s11 + $0x2c] sm:$0x1]  ;;  %v2142_v19 = vld [vmem:[%s2682_s1 + $0x220] sm:$0xff] }
  0x3c   : > { %984 = vmatpush.bf16.msrb.mxu1 %v2116_v3  ;;  %v2113_v3 = vld [vmem:[%s2682_s1 + $0x148] sm:$0xff]  ;;  %v766_v53 = vshll.u32 %v1787_v38, 16  ;;  %v780_v54 = vshll.u32 %v1789_v39, 16  ;;  %v1844_v4 = vrot.slane %v1840_v59, 9  ;;  %v2011_v38 = vld [vmem:[%s2353_s11 + $0x18] sm:$0xe] }
  0x3d   : > { %1089 = vmatpush.bf16.msrb.mxu2 %v2126_v10  ;;  %v760_v10 = vshll.u32 %v1786_v61, 16  ;;  %v1144_v17 = vsel %vm2381_vm4, %v1139_v0, %v1143_v1  ;;  %v1841_v61 = vld [vmem:[%s2353_s11 + $0x20] sm:$0xe]  ;;  %v1169_v1 = vshll.u32 %v2598_v50, 16 }
  0x3e   : > { %1249 = vmatpush.bf16.msrb.mxu3 %v2134_v11  ;;  %403 = vmatmul.bf16.gmra.mxu0 %v339_v32  ;;  %v755_v11 = vsel %vm2381_vm4, %v750_v57, %v754_v58  ;;  %v1916_v32 = vld [vmem:[%s2353_s11 + $0x10] sm:$0xf]  ;;  %v1191_v37 = vunpack.c.l.b16 %v1144_v17  ;;  %v777_v58 = vor.u32 %v776_v42, %v773_v40  ;;  %v768_v2 = vrot.slane %v766_v53, 5  ;;  %v2012_v39 = vld [vmem:[%s2353_s11 + $0x20] sm:$0xe] }
  0x3f   : > { %861 = vmatpush.bf16.msrb.mxu0 %v2107_v28  ;;  %482 = vmatmul.bf16.gmra.mxu1 %v1637_v26  ;;  %v1163_v26 = vshll.u32 %v1960_v6, 16  ;;  %v2130_v28 = vld [vmem:[%s2682_s1 + $0x1c0] sm:$0xff]  ;;  %v762_v35 = vrot.slane %v760_v10, 5  ;;  %v1845_v8 = vrot.slane %v1841_v61, 9  ;;  %v2143_v10 = vld [vmem:[%s2682_s1 + $0x228] sm:$0xff]  ;;  %v1171_v14 = vrot.slane %v1169_v1, 5 }
  0x40   : > { %985 = vmatpush.bf16.msrb.mxu1 %v2115_v29  ;;  %605 = vmatmul.bf16.gmra.mxu2 %v541_v27  ;;  %v2122_v27 = vld [vmem:[%s2682_s1 + $0x180] sm:$0xff]  ;;  %v801_v29 = vunpack.c.l.b16 %v741_v7  ;;  %v1194_v56 = vpack.c.b16 %v1191_v37, %v1190_v36  ;;  %v778_v7 = vrot.slane %v777_v58, 4  ;;  %v903_v17 = vsel %vm2393_vm5, %v1844_v4, %v902_v5  ;;  %v2140_v36 = vld [vmem:[%s2682_s1 + $0x210] sm:$0xff]  ;;  %v2013_v40 = vld [vmem:[%s2353_s11 + $0x28] sm:$0xe] }
  0x41   : > { %710 = vmatmul.bf16.gmra.mxu3 %v1749_v30  ;;  %1090 = vmatpush.bf16.msrb.mxu2 %v2125_v43  ;;  %v802_v30 = vunpack.c.l.b16 %v755_v11  ;;  %v2120_v43 = vld [vmem:[%s2353_s11 + $0x14] sm:$0xf0]  ;;  %v763_v57 = vor.u32 %v762_v35, %v759_v34  ;;  %v2010_v37 = vld [vmem:[%s2353_s11 + $0x10] sm:$0xe]  ;;  %v1283_v42 = vrot.slane %v2510_v23, 5  ;;  %v2139_v23 = vld [vmem:[%s2682_s1 + $0x208] sm:$0xff] }
  0x42   : > { %1250 = vmatpush.bf16.msrb.mxu3 %v2133_v44  ;;  %v1148_v44 = vrot.slane %v1146_v18, 4  ;;  %v1917_v55 = vor.u32 %v2120_v43, %v1916_v32  ;;  %v907_v18 = vsel %vm2393_vm5, %v1845_v8, %v906_v9  ;;  %v2141_v32 = vld [vmem:[%s2682_s1 + $0x218] sm:$0xff]  ;;  %v1287_v43 = vrot.slane %v2519_v31, 5 }
  0x43   : > { %862 = vmatpush.bf16.msrb.mxu0 %v2106_v47  ;;  %v1165_v47 = vrot.slane %v1163_v26, 5  ;;  %v805_v51 = vpack.c.b16 %v802_v30, %v801_v29  ;;  %v764_v6 = vrot.slane %v763_v57, 4  ;;  %v928_v26 = vunpack.c.l.b16 %v907_v18  ;;  %v1920_v29 = vld [vmem:[%s2353_s11 + $0x20] sm:$0xf]  ;;  %v2121_v30 = vld [vmem:[%s2353_s11 + $0x24] sm:$0xf0] }
  0x44   : > { %986 = vmatpush.bf16.msrb.mxu1 %v2114_v48  ;;  %v2595_v48 = vld [vmem:[%s2353_s11 + $0x24] sm:$0x1]  ;;  %v1921_v34 = vor.u32 %v2121_v30, %v1920_v29 }
  0x45   : > { %1091 = vmatpush.bf16.msrb.mxu2 %v2124_v52  ;;  %v929_v52 = vpack.c.b16 %v926_v25, %v925_v24  ;;  %v1166_v0 = vor.u32 %v1165_v47, %v1162_v46  ;;  %v927_v25 = vunpack.c.l.b16 %v903_v17  ;;  %v2014_v46 = vrot.slane %v2010_v37, 9 }
  0x46   : > { %1251 = vmatpush.bf16.msrb.mxu3 %v2132_v62  ;;  %v1152_v62 = vor.u32 %v1151_v45, %v1148_v44  ;;  %v1291_v44 = vrot.slane %v2595_v48, 5  ;;  %v1295_v45 = vrot.slane %v2598_v50, 5  ;;  %v2015_v47 = vrot.slane %v2011_v38, 9 }
  0x47   : > { %863 = vmatpush.bf16.msrb.mxu0 %v2105_v63  ;;  %v1155_v63 = vshll.u32 %v2595_v48, 16  ;;  %v1167_v13 = vrot.slane %v1166_v0, 4  ;;  %v1284_v31 = vsel %vm2393_vm5, %v2014_v46, %v1283_v42 }
  0x48   : > { %987 = vmatpush.bf16.msrb.mxu1 %v2113_v3  ;;  %v782_v3 = vrot.slane %v780_v54, 5  ;;  %v1153_v11 = vrot.slane %v1152_v62, 4  ;;  %v1288_v48 = vsel %vm2393_vm5, %v2015_v47, %v1287_v43  ;;  %v2138_v54 = vld [vmem:[%s2682_s1 + $0x200] sm:$0xff] }
  0x49   : > { %1092 = vmatpush.bf16.msrb.mxu2 %v2123_v15  ;;  %v1157_v12 = vrot.slane %v1155_v63, 5  ;;  %v769_v15 = vsel %vm2381_vm4, %v764_v6, %v768_v2 }
  0x4a   : > { %1252 = vmatpush.bf16.msrb.mxu3 %v2131_v16  ;;  %v783_v16 = vsel %vm2381_vm4, %v778_v7, %v782_v3 }
  0x4b   : > { %864 = vmatpush.bf16.msrb.mxu0 %v2104_v21  ;;  %v1158_v20 = vsel %vm2381_vm4, %v1153_v11, %v1157_v12  ;;  %v1172_v21 = vsel %vm2381_vm4, %v1167_v13, %v1171_v14  ;;  %v804_v24 = vunpack.c.l.b16 %v783_v16 }
  0x4c   : > { %988 = vmatpush.bf16.msrb.mxu1 %v2112_v22  ;;  %v803_v22 = vunpack.c.l.b16 %v769_v15 }
  0x4d   : > { %1093 = vmatpush.bf16.msrb.mxu2 %v2122_v27  ;;  %v1192_v27 = vunpack.c.l.b16 %v1158_v20 }
  0x4e   : > { %1253 = vmatpush.bf16.msrb.mxu3 %v2130_v28  ;;  %865 = vmatmul.bf16.vlgmr.msrb.gmra.mxu0 %v805_v51  ;;  %v1193_v28 = vunpack.c.l.b16 %v1172_v21  ;;  %v806_v41 = vpack.c.b16 %v804_v24, %v803_v22  ;;  %v2016_v51 = vrot.slane %v2012_v39, 9 }
  0x4f   : > { %1370 = vmatpush.bf16.msra.mxu0 %v2145_v33  ;;  %989 = vmatmul.bf16.vlgmr.msrb.gmra.mxu1 %v929_v52  ;;  %v2017_v52 = vrot.slane %v2013_v40, 9 }
  0x50   : > { %2157 = vmatpush.bf16.msra.mxu1 %v2145_v33  ;;  %1094 = vmatmul.bf16.vlgmr.msrb.gmra.mxu2 %v1917_v55  ;;  %v930_v33 = vpack.c.b16 %v928_v26, %v927_v25  ;;  %v1195_v35 = vpack.c.b16 %v1193_v28, %v1192_v27  ;;  %v1292_v50 = vsel %vm2393_vm5, %v2016_v51, %v1291_v44  ;;  %v1314_v55 = vunpack.c.l.b16 %v1284_v31 }
  0x51   : > { %1254 = vmatmul.bf16.vlgmr.msrb.gmra.mxu3 %v1194_v56  ;;  %v1296_v53 = vsel %vm2393_vm5, %v2017_v52, %v1295_v45  ;;  %v1315_v56 = vunpack.c.l.b16 %v1288_v48  ;;  %v1316_v57 = vunpack.c.l.b16 %v1292_v50 }
  0x52   : > { %v1317_v58 = vunpack.c.l.b16 %v1296_v53 }
  0x53   : > { %1371 = vmatpush.bf16.msra.mxu0 %v2144_v60  ;;  %v1318_v59 = vpack.c.b16 %v1315_v56, %v1314_v55 }
  0x54   : > { %2158 = vmatpush.bf16.msra.mxu1 %v2144_v60  ;;  %v1319_v60 = vpack.c.b16 %v1317_v58, %v1316_v57 }
  0x57   : > { %1372 = vmatpush.bf16.msra.mxu0 %v2143_v10 }
  0x58   : > { %2159 = vmatpush.bf16.msra.mxu1 %v2143_v10 }
  0x5b   : > { %1373 = vmatpush.bf16.msra.mxu0 %v2142_v19 }
  0x5c   : > { %2160 = vmatpush.bf16.msra.mxu1 %v2142_v19 }
  0x5e   : > { %870 = vmatmul.bf16.gmra.mxu0 %v806_v41 }
  0x5f   : > { %1374 = vmatpush.bf16.msra.mxu0 %v2141_v32  ;;  %994 = vmatmul.bf16.gmra.mxu1 %v930_v33 }
  0x60   : > { %2161 = vmatpush.bf16.msra.mxu1 %v2141_v32  ;;  %1099 = vmatmul.bf16.gmra.mxu2 %v1921_v34 }
  0x61   : > { %1259 = vmatmul.bf16.gmra.mxu3 %v1195_v35 }
  0x63   : > { %1375 = vmatpush.bf16.msra.mxu0 %v2140_v36 }
  0x64   : > { %2162 = vmatpush.bf16.msra.mxu1 %v2140_v36 }
  0x67   : > { %1376 = vmatpush.bf16.msra.mxu0 %v2139_v23 }
  0x68   : > { %2163 = vmatpush.bf16.msra.mxu1 %v2139_v23 }
  0x6b   : > { %1377 = vmatpush.bf16.msra.mxu0 %v2138_v54 }
  0x6c   : > { %2164 = vmatpush.bf16.msra.mxu1 %v2138_v54 }
  0x6e   : > { %1378 = vmatmul.bf16.vlgmr.msra.gmra.mxu0 %v1318_v59 }
  0x6f   : > { %1383 = vmatmul.bf16.vlgmr.msra.gmra.mxu1 %v1319_v60 }
  0xab   : > { %v399_v61 = vpop.f32.mrf.mxu0 }
  0xac   : > { %v478_v62 = vpop.f32.mrf.mxu1 }
  0xad   : > { %v479_v18 = vadd.f32 %v478_v62, %v399_v61 }
  0xb3   : > { %v601_v49 = vpop.f32.mrf.mxu2  ;;  %v401_v0 = vpop.f32.mrf.mxu0 }
  0xb4   : > { %v706_v63 = vpop.f32.mrf.mxu3  ;;  %v480_v1 = vpop.f32.mrf.mxu1  ;;  %v611_v21 = vadd.f32 %v601_v49, %v479_v18 }
  0xb5   : > { %v481_v28 = vadd.f32 %v480_v1, %v401_v0 }
  0xb6   : > { %v716_v27 = vadd.f32 %v706_v63, %v611_v21 }
  0xbb   : > { %v603_v2 = vpop.f32.mrf.mxu2  ;;  %v404_v4 = vpop.f32.mrf.mxu0 }
  0xbc   : > { %v708_v3 = vpop.f32.mrf.mxu3  ;;  %v483_v5 = vpop.f32.mrf.mxu1  ;;  %v612_v32 = vadd.f32 %v603_v2, %v481_v28 }
  0xbd   : > { %v484_v25 = vadd.f32 %v483_v5, %v404_v4 }
  0xbe   : > { %v717_v40 = vadd.f32 %v708_v3, %v612_v32 }
  0xc3   : > { %v606_v6 = vpop.f32.mrf.mxu2  ;;  %v406_v8 = vpop.f32.mrf.mxu0 }
  0xc4   : > { %v711_v7 = vpop.f32.mrf.mxu3  ;;  %v485_v9 = vpop.f32.mrf.mxu1  ;;  %v613_v26 = vadd.f32 %v606_v6, %v484_v25 }
  0xc5   : > { %v486_v29 = vadd.f32 %v485_v9, %v406_v8 }
  0xc6   : > { %v718_v41 = vadd.f32 %v711_v7, %v613_v26 }
  0xcb   : > { %v608_v10 = vpop.f32.mrf.mxu2  ;;  %v866_v12 = vpop.f32.mrf.mxu0 }
  0xcc   : > { %v713_v11 = vpop.f32.mrf.mxu3  ;;  %v990_v13 = vpop.f32.mrf.mxu1  ;;  %v876_v30 = vadd.f32 %v866_v12, %v716_v27  ;;  %v614_v33 = vadd.f32 %v608_v10, %v486_v29 }
  0xce   : > { %v1000_v38 = vadd.f32 %v990_v13, %v876_v30  ;;  %v719_v42 = vadd.f32 %v713_v11, %v614_v33 }
  0xd3   : > { %v1095_v14 = vpop.f32.mrf.mxu2  ;;  %v868_v16 = vpop.f32.mrf.mxu0 }
  0xd4   : > { %v1255_v15 = vpop.f32.mrf.mxu3  ;;  %v992_v17 = vpop.f32.mrf.mxu1  ;;  %v1105_v43 = vadd.f32 %v1095_v14, %v1000_v38  ;;  %v877_v44 = vadd.f32 %v868_v16, %v717_v40 }
  0xd6   : > { %v1265_v52 = vadd.f32 %v1255_v15, %v1105_v43  ;;  %v1001_v48 = vadd.f32 %v992_v17, %v877_v44 }
  0xdb   : > { %v1097_v19 = vpop.f32.mrf.mxu2  ;;  %v871_v22 = vpop.f32.mrf.mxu0 }
  0xdc   : > { %v1257_v20 = vpop.f32.mrf.mxu3  ;;  %v995_v24 = vpop.f32.mrf.mxu1  ;;  %v878_v37 = vadd.f32 %v871_v22, %v718_v41  ;;  %v1106_v54 = vadd.f32 %v1097_v19, %v1001_v48 }
  0xde   : > { %v1002_v45 = vadd.f32 %v995_v24, %v878_v37  ;;  %v1266_v60 = vadd.f32 %v1257_v20, %v1106_v54 }
  0xe3   : > { %v1100_v34 = vpop.f32.mrf.mxu2  ;;  %v873_v35 = vpop.f32.mrf.mxu0 }
  0xe4   : > { %v997_v36 = vpop.f32.mrf.mxu1  ;;  %v1260_v39 = vpop.f32.mrf.mxu3  ;;  %v879_v46 = vadd.f32 %v873_v35, %v719_v42  ;;  %v1107_v47 = vadd.f32 %v1100_v34, %v1002_v45 }
  0xe6   : > { %v1003_v50 = vadd.f32 %v997_v36, %v879_v46  ;;  %v1267_v55 = vadd.f32 %v1260_v39, %v1107_v47 }
  0xeb   : > { %v1102_v51 = vpop.f32.mrf.mxu2  ;;  %v1379_v23 = vpop.f32.mrf.mxu0 }
  0xec   : > { %v1384_v31 = vpop.f32.mrf.mxu1  ;;  %v1389_v53 = vadd.f32 %v1379_v23, %v1265_v52  ;;  %v1108_v56 = vadd.f32 %v1102_v51, %v1003_v50  ;;  %v1262_v57 = vpop.f32.mrf.mxu3 }
  0xed   : > { %v1391_v58 = vadd.f32 %v1384_v31, %v1267_v55 }
  0xee   : > { %v1393_v59 = vpack.c.bf16 %v1389_v53, %v1389_v53  ;;  %v1268_v61 = vadd.f32 %v1262_v57, %v1108_v56 }
  0xef   : > { %v1395_v63 = vpack.c.bf16 %v1391_v58, %v1391_v58 }
  0xf0   : > { %v1401_v2 = vunpack.c.l.bf16 %v1393_v59 }
  0xf1   : > { %v1403_v7 = vunpack.c.l.bf16 %v1395_v63 }
  0xf2   : > { %v1414_v9 = vmul.f32 %v1401_v2, %v1401_v2 }
  0xf3   : > { %v1381_v62 = vpop.f32.mrf.mxu0  ;;  %v1416_v13 = vmul.f32 %v1403_v7, %v1403_v7 }
  0xf4   : > { %v1386_v49 = vpop.f32.mrf.mxu1  ;;  %v1390_v0 = vadd.f32 %v1381_v62, %v1266_v60 }
  0xf5   : > { %v1392_v1 = vadd.f32 %v1386_v49, %v1268_v61 }
  0xf6   : > { %v1394_v3 = vpack.c.bf16 %v1390_v0, %v1390_v0  ;;  %v2149_v4 = vpack.c.bf16 %v1390_v0, %v1389_v53 }
  0xf7   : > { %v1396_v5 = vpack.c.bf16 %v1392_v1, %v1392_v1  ;;  %v2154_v6 = vpack.c.bf16 %v1392_v1, %v1391_v58 }
  0xf8   : > { %2150 = vst [vmem:[%s224_s22] sm:$0xff] %v2149_v4   ;;  %v1402_v8 = vunpack.c.l.bf16 %v1394_v3 }
  0xf9   : > { %2156 = vst [vmem:[%s224_s22 + $0x8] sm:$0xff] %v2154_v6   ;;  %v1404_v12 = vunpack.c.l.bf16 %v1396_v5 }
  0xfa   : > { %v1405_v10 = vadd.f32 %v1402_v8, %v1401_v2  ;;  %v1415_v11 = vmul.f32 %v1402_v8, %v1402_v8 }
  0xfb   : > { %v1417_v17 = vmul.f32 %v1404_v12, %v1404_v12 }
  0xfc   : > { %v1418_v14 = vadd.f32 %v1415_v11, %v1414_v9  ;;  %v1406_v15 = vadd.f32 %v1405_v10, %v1403_v7 }
  0xfe   : > { %v1407_v16 = vadd.f32 %v1406_v15, %v1404_v12  ;;  %v1419_v18 = vadd.f32 %v1418_v14, %v1416_v13 }
 0x100   : > { %v1408_v19 = vrot.slane %v1407_v16, 4  ;;  %v1420_v20 = vadd.f32 %v1419_v18, %v1417_v17 }
 0x102   : > { %v1409_v21 = vadd.f32 %v1408_v19, %v1407_v16  ;;  %v1421_v22 = vrot.slane %v1420_v20, 4 }
 0x104   : > { %v1410_v24 = vrot.slane %v1409_v21, 2  ;;  %v1422_v25 = vadd.f32 %v1421_v22, %v1420_v20 }
 0x106   : > { %v1411_v26 = vadd.f32 %v1410_v24, %v1409_v21  ;;  %v1423_v27 = vrot.slane %v1422_v25, 2 }
 0x108   : > { %v1412_v28 = vrot.slane %v1411_v26, 1  ;;  %v1424_v29 = vadd.f32 %v1423_v27, %v1422_v25 }
 0x10a   : > { %v1425_v30 = vrot.slane %v1424_v29, 1  ;;  %v1413_v32 = vadd.f32 %v1412_v28, %v1411_v26 }
 0x10c   : > { %v1426_v41 = vadd.f32 %v1425_v30, %v1424_v29 }
 0x10e   : > { %v1428_v33 = vsel %vm1427_vm6, %v1413_v32, %v1426_v41 }
 0x10f   : > { %1429 = vst [vmem:[%s233_s29] sm:$0x3] %v1428_v33 }
 0x110 PF: > { %s14_s16 = sadd.s32 1, %s2244_s16   ;;  %s2689_s12 = smov %s2236_s14 }
 0x111   : > { %p11_p9 = scmp.ge.s32.totalorder %s14_s16, 6   ;;  %s2690_s13 = smov %s2240_s15 }
 0x112   : > { %s2691_s14 = smov %s2694_s17  ;;  %s2692_s15 = smov %s2698_s18 }
 0x113   :  { %13 = sbr.rel (!%p11_p9) target bundleno = 3 (0x3), region = 80 }

</bundles_post_ra>
